<compile_context>
chip_gen: v6e
topology: v6e:2x2x1
jax: 0.10.0
libtpu: 0.0.40
codegen_flags: <defaults>
</compile_context>

<pallas_src>
import jax
import jax.numpy as jnp
from jax.experimental import pallas as pl
from jax.experimental.pallas import tpu as pltpu

LANES = 128
TARGET_BLOCK_BYTES = 4 * 1024 * 1024   # ~4 MiB per block per buffer


def _round_up(a, b):
    return ((a + b - 1) // b) * b


def _h_sigmoid_math_f32(x_f32):
    # relu6(x + 3) / 6  ==  clamp(x + 3, 0, 6) * (1/6), computed in f32.
    return jnp.clip(x_f32 + 3.0, 0.0, 6.0) * (1.0 / 6.0)


def _h_sigmoid_kernel(x_ref, o_ref):
    x = x_ref[...].astype(jnp.float32)          # f32 math, free (HBM-bound)
    o_ref[...] = _h_sigmoid_math_f32(x).astype(o_ref.dtype)


def h_sigmoid(x, *, donate_input=False):
    """Elementwise hard-sigmoid matching torch's relu6(x+3)/6. x is NCHW (any shape)."""
    orig_shape, orig_dtype = x.shape, x.dtype
    n = x.size
    itemsize = jnp.dtype(orig_dtype).itemsize

    x_flat = x.reshape(-1)

    rows = n // LANES                 # 128-lane-aligned prefix goes to the kernel
    n_pre = rows * LANES
    n_tail = n - n_pre

    if rows == 0:
        # Tiny input (< 128 elements): not worth a kernel launch.
        y = _h_sigmoid_math_f32(x_flat.astype(jnp.float32)).astype(orig_dtype)
        return y.reshape(orig_shape)

    # Sublane multiple for this dtype's native tiling (f32: 8, bf16: 16, int8/fp8: 32),
    # used only for the block shape — the array extent may be ragged.
    row_mult = 8 * max(1, 4 // itemsize)

    if rows <= row_mult:
        # Single full-extent block (allowed even when rows isn't 8-aligned).
        block_rows = rows
    else:
        max_block_rows = max(row_mult, TARGET_BLOCK_BYTES // (LANES * itemsize))
        steps = pl.cdiv(rows, max_block_rows)
        if steps == 1:
            steps = 2                 # >= 2 grid steps: keep both v7x TCs streaming
        elif steps % 2:
            steps += 1                # even split for 2-TC load balance
        block_rows = min(_round_up(pl.cdiv(rows, steps), row_mult), rows)

    grid = (pl.cdiv(rows, block_rows),)
    block = (block_rows, LANES)

    x2d = (x_flat if n_tail == 0 else x_flat[:n_pre]).reshape(rows, LANES)

    out2d = pl.pallas_call(
        _h_sigmoid_kernel,
        out_shape=jax.ShapeDtypeStruct((rows, LANES), orig_dtype),
        grid_spec=pltpu.PrefetchScalarGridSpec(
            num_scalar_prefetch=0,
            grid=grid,
            in_specs=[pl.BlockSpec(block, lambda i: (i, 0))],
            out_specs=pl.BlockSpec(block, lambda i: (i, 0)),
        ),
        compiler_params=pltpu.CompilerParams(
            dimension_semantics=("parallel",),
            vmem_limit_bytes=32 * 1024 * 1024,
        ),
        cost_estimate=pl.CostEstimate(
            flops=4 * n_pre,
            transcendentals=0,
            bytes_accessed=2 * n_pre * itemsize,
        ),
        # Only alias the HBM buffer when the caller actually donates x (e.g.
        # under jit with donate_argnums); otherwise XLA would insert a copy.
        input_output_aliases={0: 0} if donate_input else {},
    )(x2d)

    out_flat = out2d.reshape(-1)
    if n_tail:
        tail = _h_sigmoid_math_f32(
            x_flat[n_pre:].astype(jnp.float32)).astype(orig_dtype)
        out_flat = jnp.concatenate([out_flat, tail])
    return out_flat.reshape(orig_shape)


if __name__ == "__main__":
    key = jax.random.PRNGKey(0)

    # NCHW input, small shape consistent with the module.
    x = jax.random.normal(key, (2, 4, 16, 16), dtype=jnp.float32) * 4.0
    y = jax.block_until_ready(h_sigmoid(x))
    y_ref = jnp.clip(x + 3.0, 0.0, 6.0) / 6.0
    assert y.shape == x.shape and y.dtype == x.dtype
    assert jnp.allclose(y, y_ref, atol=1e-6, rtol=1e-6)

    # Non-128-aligned size: exercises the ragged final block + jnp tail path.
    x2 = jax.random.normal(jax.random.PRNGKey(1), (3, 5, 7, 11), dtype=jnp.float32) * 4.0
    y2 = jax.block_until_ready(h_sigmoid(x2))
    y2_ref = jnp.clip(x2 + 3.0, 0.0, 6.0) / 6.0
    assert jnp.allclose(y2, y2_ref, atol=1e-6, rtol=1e-6)

    # bf16 input: f32 in-kernel math, cast back on store.
    x3 = (jax.random.normal(jax.random.PRNGKey(2), (2, 8, 32, 32)) * 4.0).astype(jnp.bfloat16)
    y3 = jax.block_until_ready(h_sigmoid(x3))
    y3_ref = (jnp.clip(x3.astype(jnp.float32) + 3.0, 0.0, 6.0) / 6.0).astype(jnp.bfloat16)
    assert y3.dtype == x3.dtype
    assert jnp.allclose(y3.astype(jnp.float32), y3_ref.astype(jnp.float32),
                        atol=1e-2, rtol=1e-2)

    print("KERNEL_OK")
</pallas_src>

<mosaic_0001>
module attributes {stable_mosaic.version = 11 : i64} {
  func.func @_h_sigmoid_kernel(%arg0: i32, %arg1: memref<8x128xf32, #tpu.memory_space<vmem>>, %arg2: memref<8x128xf32, #tpu.memory_space<vmem>>) attributes {dimension_semantics = [#tpu.dimension_semantics<parallel>], iteration_bounds = array<i64: 2>, scalar_prefetch = 0 : i64, scratch_operands = 0 : i64, tpu.core_type = #tpu.core_type<tc>, window_params = [{transform_indices = @transform_0, window_bounds = array<i64: 8, 128>}, {transform_indices = @transform_1, window_bounds = array<i64: 8, 128>}]} {
    %c0 = arith.constant 0 : index
    %c0_0 = arith.constant 0 : index
    %0 = vector.load %arg1[%c0, %c0_0] : memref<8x128xf32, #tpu.memory_space<vmem>>, vector<8x128xf32>
    %cst = arith.constant 3.000000e+00 : f32
    %1 = vector.broadcast %cst : f32 to vector<8x128xf32>
    %2 = arith.addf %0, %1 : vector<8x128xf32>
    %cst_1 = arith.constant 0.000000e+00 : f32
    %cst_2 = arith.constant 6.000000e+00 : f32
    %3 = vector.broadcast %cst_1 : f32 to vector<8x128xf32>
    %4 = arith.maximumf %3, %2 : vector<8x128xf32>
    %5 = vector.broadcast %cst_2 : f32 to vector<8x128xf32>
    %6 = arith.minimumf %5, %4 : vector<8x128xf32>
    %cst_3 = arith.constant 0.166666672 : f32
    %7 = vector.broadcast %cst_3 : f32 to vector<8x128xf32>
    %8 = arith.mulf %6, %7 : vector<8x128xf32>
    %c0_4 = arith.constant 0 : index
    %c0_5 = arith.constant 0 : index
    %9 = vector.load %arg2[%c0_4, %c0_5] : memref<8x128xf32, #tpu.memory_space<vmem>>, vector<8x128xf32>
    tpu.vector_store %arg2[%c0_4, %c0_5], %8 {strides = array<i32>} : memref<8x128xf32, #tpu.memory_space<vmem>>, vector<8x128xf32>,
    return
  }
  func.func @transform_0(%arg0: i32) -> (i32, i32) {
    %c0_i32 = arith.constant 0 : i32
    %c0_i32_0 = arith.constant 0 : i32
    return %arg0, %c0_i32 : i32, i32
  }
  func.func @transform_1(%arg0: i32) -> (i32, i32) {
    %c0_i32 = arith.constant 0 : i32
    %c0_i32_0 = arith.constant 0 : i32
    return %arg0, %c0_i32 : i32, i32
  }
}

</mosaic_0001>

<bundles_post_ra>
// kernel: tpu_custom_call.1
= control target key start
LH: loop header
LB: loop body
LE: loop exit
PB: predicated region body
PF: predicated region fallthrough
CT: control target
= control target key end

     0   :  { %6 = vsyncpa [#allocation3], 0  ;;  %s527_s0 = inlined_call_operand.hbm [shape: f32[16,128], index: 0, kind: input, shape index: {}]   ;;  %s528_s1 = inlined_call_operand.hbm [shape: f32[16,128], index: 1, kind: output, shape index: {}]  }
   0x1   :  { %8 = vsyncpa [#allocation3 + $0x1], 0 }
   0x2   :  { %9 = vsyncpa [#allocation4], 0 }
   0x3   :  { %11 = vsyncpa [#allocation4 + $0x1], 0  ;;  %s386_s6 = smov 0   ;;  %s388_s7 = smov 0  }
   0x4   :  { %s390_s8 = smov 0   ;;  %s392_s9 = smov 0  }
   0x5 LB: > { %s407_s10 = sadd.s32 4294967295, %s372_s9   ;;  %s222_s11 = sadd.s32 4294967294, %s372_s9   ;;  %s372_s9 = sphi %s392_s9, %s545_s9   ;;  %s368_s8 = sphi %s390_s8, %s544_s8   ;;  %s364_s7 = sphi %s388_s7, %s543_s7   ;;  %s360_s6 = sphi %s386_s6, %s542_s6  }
   0x6   : > { %s411_s12 = sadd.s32 1, %s372_s9   ;;  %s24_s13 = sadd.s32 1, %s368_s8 }
   0x7   : > { %s21_s14 = ssub.s32 %s372_s9, %s411_s12  ;;  %p31_p0 = scmp.ne.s32.totalorder %s368_s8, %s364_s7 }
   0x8   : > { %p22_p1 = scmp.eq.s32.totalorder %s21_s14, 0  ;;  %p32_p2 = scmp.eq.s32.totalorder %s372_s9, 0 }
   0x9   : > { %p37_p3 = scmp.ne.s32.totalorder %s364_s7, %s360_s6  ;;  %p38_p4 = scmp.eq.s32.totalorder %s407_s10, 0 }
   0xa   : > { %s423_s15 = scalar_select %p22_p1, %s368_s8, %s24_s13  }
   0xb   : > { %p425_p5 = por %p32_p2, %p31_p0  ;;  %p429_p6 = por %p38_p4, %p37_p3 }
   0xc   : > { %p61_p7 = scmp.eq.s32.totalorder %s407_s10, 1  ;;  %p67_p8 = scmp.eq.s32.totalorder %s222_s11, 1 }
   0xd   : > { %s532_s17 = scalar_select %p429_p6, 1, 0 }
   0xe   : > { %p246_p10 = scmp.lt.s32.totalorder %s372_s9, 2  ;;  %p436_p11 = por %p61_p7, %p31_p0 }
   0xf   : > { %p440_p12 = por %p67_p8, %p37_p3  ;;  %s87_s20 = sand.u32 1, %s368_s8  }
  0x10   : > { %s533_s18 = scalar_select %p436_p11, 1, 0 }
  0x11   : > { %s534_s19 = scalar_select %p440_p12, 1, 0 }
  0x12   : > { %s226_s21 = sshll.u32 %s372_s9, 7  ;;  %s225_s22 = sshll.u32 %s87_s20, 3 }
  0x13   : > { %s449_s25 = scalar_lea.hbm %s527_s0, %s226_s21  ;;  %s91_s26 = scalar_lea.vmem [#allocation2], %s225_s22 }
  0x14   : > { %s98_s27 = sshll.u32 %s91_s26, 4  ;;  %p453_p13 = pnand %p246_p10, %p425_p5  ;;  %s457_s27 = int_to_ptr.vmem [resolvable:$true] %s98_s27 }
  0x15   : > { %s88_s29 = scalar_lea.sflag [#allocation3], %s87_s20  ;;  %s280_s30 = scalar_lea.hbm %s449_s25, 128 }
  0x16   : > { %p281_p2 = scmp.ne.s32.totalorder %s449_s25, %s280_s30  ;;  %p282_p3 = pneg %p453_p13 }
  0x17   : > { %s285_s4 = scalar_lea.hbm %s527_s0, 256  ;;  %p286_p5 = scmp.lt.s32.totalorder %s449_s25, %s527_s0 }
  0x18   : > { %p283_p4 = pnand %p282_p3, %p281_p2  ;;  %p287_p8 = scmp.lt.s32.totalorder %s285_s4, %s280_s30 }
  0x1a   : > { %p284_p7 = pneg %p283_p4  ;;  %p288_p10 = por %p287_p8, %p286_p5 }
  0x1c   : > { %p289_p9 = pnand %p288_p10, %p284_p7 }
  0x1e   : > { %292 = shalt.err (!%p289_p9)
}
  0x1f   : > { %s293_s13 = scalar_lea.vmem %s457_s27, 128  ;;  %s374_s14 = smov [#allocation2]  }
  0x20   : > { %p294_p0 = scmp.ne.s32.totalorder %s457_s27, %s293_s13  ;;  %s298_s16 = sshll.u32 %s374_s14, 4  ;;  %s299_s16 = int_to_ptr.vmem [resolvable:$false] %s298_s16 }
  0x21   : > { %s300_s20 = scalar_lea.vmem %s299_s16, 256  ;;  %p301_p4 = scmp.lt.s32.totalorder %s457_s27, %s299_s16 }
  0x22   : > { %p296_p1 = pnand %p294_p0, %p282_p3  ;;  %p302_p12 = scmp.lt.s32.totalorder %s300_s20, %s293_s13 }
  0x24   : > { %p297_p2 = pneg %p296_p1  ;;  %p303_p11 = por %p302_p12, %p301_p4 }
  0x26   : > { %p304_p6 = pnand %p303_p11, %p297_p2 }
  0x28   : > { %307 = shalt.err (!%p304_p6)
}
  0x29   : > { %241 = dma.hbm_to_vmem [thread:$0]  (!%p453_p13), %s449_s25, 128, %s457_s27, %s88_s29  }
  0x2a   : > { %p536_p9 = scmp.lt.s32.totalorder %s372_s9, 3  ;;  %p537_p7 = scmp.ge.s32.totalorder %s372_s9, 1 }
  0x2c   : > { %p104_p0 = pnand %p537_p7, %p536_p9 }
  0x2d   : > { %s484_s21 = sand.u32 (!%p104_p0), 1, %s364_s7   ;;  %p538_p6 = scmp.ne.s32.totalorder (!%p104_p0), %s532_s17, 0 }
  0x2e   : > { %107 = sbr.rel (%p104_p0) target bundleno = 77 (0x4d), region = 24  ;;  %s228_s22 = sshll.u32 (!%p104_p0), %s484_s21, 3 }
  0x2f   : > { %s110_s23 = scalar_lea.sflag (!%p104_p0), [#allocation3], %s484_s21  ;;  %s113_s24 = scalar_lea.vmem (!%p104_p0), [#allocation2], %s228_s22 }
  0x33   : > { %351 = dma.done.wait (%p538_p6), %s110_s23, 128  }
  0x34   : > { %353 = vsyncadd (%p538_p6), %s110_s23, 4294967168  ;;  %v132_v0 = vld [vmem:[%s113_s24] sm:$0xff]  ;;  %s131_s25 = scalar_lea.vmem [#allocation5], %s228_s22  ;;  %s231_s27 = sshll.u32 %s407_s10, 7 }
  0x35   : > { %v133_v1 = vadd.f32 3.0, %v132_v0  ;;  %s152_s26 = sshll.u32 %s131_s25, 4  ;;  %s150_s30 = scalar_lea.hbm %s528_s1, %s231_s27  ;;  %s153_s26 = int_to_ptr.vmem [resolvable:$true] %s152_s26 }
  0x36   : > { %s139_s2 = scalar_lea.sflag [#allocation4], %s484_s21  ;;  %s308_s17 = scalar_lea.vmem %s153_s26, 128 }
  0x37   : > { %v134_v2 = vmax.f32 %v133_v1, 0.0  ;;  %p309_p11 = scmp.ne.s32.totalorder %s153_s26, %s308_s17  ;;  %p539_p12 = scmp.ne.s32.totalorder %s533_s18, 0 }
  0x38   : > { %s375_s3 = smov [#allocation5]  }
  0x39   : > { %v135_v3 = vmin.f32 %v134_v2, 6.0  ;;  %p310_p13 = pnand %p309_p11, %p539_p12  ;;  %s312_s4 = sshll.u32 %s375_s3, 4  ;;  %s313_s4 = int_to_ptr.vmem [resolvable:$false] %s312_s4 }
  0x3a   : > { %s314_s5 = scalar_lea.vmem %s313_s4, 256  ;;  %p315_p3 = scmp.lt.s32.totalorder %s153_s26, %s313_s4 }
  0x3b   : > { %v136_v4 = vmul.f32 0.16666667, %v135_v3  ;;  %p311_p1 = pneg %p310_p13  ;;  %p316_p5 = scmp.lt.s32.totalorder %s314_s5, %s308_s17 }
  0x3d   : > { %137 = vst [vmem:[%s131_s25] sm:$0xff] %v136_v4  ;;  %p317_p8 = por %p316_p5, %p315_p3 }
  0x3f   : > { %p318_p10 = pnand %p317_p8, %p311_p1 }
  0x41   : > { %321 = shalt.err (!%p318_p10)
}
  0x42   : > { %s322_s10 = scalar_lea.hbm %s150_s30, 128  ;;  %s326_s14 = scalar_lea.hbm %s528_s1, 256 }
  0x43   : > { %p323_p2 = scmp.ne.s32.totalorder %s150_s30, %s322_s10  ;;  %p327_p7 = scmp.lt.s32.totalorder %s150_s30, %s528_s1 }
  0x44   : > { %p328_p0 = scmp.lt.s32.totalorder %s326_s14, %s322_s10 }
  0x45   : > { %p324_p4 = pnand %p323_p2, %p539_p12 }
  0x46   : > { %p329_p6 = por %p328_p0, %p327_p7 }
  0x47   : > { %p325_p9 = pneg %p324_p4 }
  0x49   : > { %p330_p11 = pnand %p329_p6, %p325_p9 }
  0x4b   : > { %333 = shalt.err (!%p330_p11)
}
  0x4c   : > { %236 = dma.vmem_to_hbm [thread:$0]  (%p539_p12), %s153_s26, 128, %s150_s30, %s139_s2  }
  0x4d PF: > { %s164_s21 = sand.u32 1, %s360_s6   ;;  %p540_p13 = scmp.ne.s32.totalorder %s534_s19, 0 }
  0x4e   : > { %p541_p1 = scmp.ge.s32.totalorder %s372_s9, 2  ;;  %s165_s22 = scalar_lea.sflag [#allocation4], %s164_s21 }
  0x50   : > { %p243_p3 = pnand %p541_p1, %p540_p13 }
  0x52   : > { %p244_p5 = pneg %p243_p3 }
  0x54   : > { %355 = dma.done.wait (%p244_p5), %s165_s22, 128  }
  0x55   : > { %357 = vsyncadd (%p244_p5), %s165_s22, 4294967168  ;;  %p14_p8 = scmp.ge.s32.totalorder %s411_s12, 4   ;;  %s542_s6 = smov %s364_s7 }
  0x56   : > { %s543_s7 = smov %s368_s8  ;;  %s544_s8 = smov %s423_s15 }
  0x57   : > { %s545_s9 = smov %s411_s12  ;;  %16 = sbr.rel (!%p14_p8) target bundleno = 5 (0x5), region = 69 }
  0x5c   :  { %170 = vsyncpa [#allocation3], 1 }
  0x5d   :  { %172 = vsyncpa [#allocation3 + $0x1], 1 }
  0x5e   :  { %173 = vsyncpa [#allocation4], 1 }
  0x5f   :  { %175 = vsyncpa [#allocation4 + $0x1], 1 }

</bundles_post_ra>
